<compile_context>
chip_gen: v6e
topology: v6e:2x2x1
jax: 0.10.0
libtpu: 0.0.40
codegen_flags: <defaults>
</compile_context>

<pallas_src>
import math
from functools import partial

import numpy as np
import jax
import jax.numpy as jnp
from jax import lax
from jax.experimental import pallas as pl
from jax.experimental.pallas import tpu as pltpu

K_CURVATURE = 1.0  # geoopt.manifolds.Lorentz() default; the module has no other params


# ----------------------------------------------------------------------------- helpers
def _sublane(itemsize):
    # rows per sublane group: 8 for 4-byte, 16 for 2-byte, 32 for 1-byte dtypes
    return 8 * max(1, 4 // max(1, int(itemsize)))


def _pick_tile_rows(n_rows, hbm_bytes_per_row, vmem_bytes_per_row, itemsize,
                    target_step_bytes=4 << 20, vmem_budget=12 << 20, min_steps=8):
    """Rows per grid step: big enough to amortize the ~0.35us step overhead, small enough
    to keep double-buffered blocks inside scoped VMEM on every generation and to leave
    >= min_steps steps for the v7x megacore split / pipeline overlap."""
    align = _sublane(itemsize)
    if n_rows <= align:
        return n_rows                                   # single full block (tiny input)
    tn = target_step_bytes // max(1, hbm_bytes_per_row)
    tn = min(tn, vmem_budget // max(1, vmem_bytes_per_row))
    tn = min(tn, -(-n_rows // min_steps))
    return max(align, (tn // align) * align)


def _dense_group(n_rows, d_minus_1, max_lanes=4096, max_group=128):
    """Logical rows packed per output row: smallest g0 with g0*(D-1) % 128 == 0, scaled up
    (denser coef tile) while it still divides the total row count.  None -> use fallback."""
    if d_minus_1 < 1:
        return None
    g0 = 128 // math.gcd(d_minus_1, 128)
    if n_rows % g0 != 0:
        return None
    cap = max(g0, min(max_group, max_lanes // d_minus_1))
    best = g0
    for m in range(cap // g0, 0, -1):
        if n_rows % (g0 * m) == 0:
            best = g0 * m
            break
    return best


def _coef(time_col, inv_sqrt_k):
    """arcosh(alpha)/sqrt(alpha^2-1) with geoopt's 1e-15 clamp, alpha = t/sqrt(k).
    Kept in f32 (parity with geoopt near alpha->1); rsqrt uses the otherwise idle EUP."""
    alpha = time_col * inv_sqrt_k
    d2 = jnp.maximum(alpha * alpha - 1.0, 1e-15)
    inv = lax.rsqrt(d2)
    return jnp.log(alpha + d2 * inv) * inv            # log(alpha + sqrt(d2)) / sqrt(d2)


# ----------------------------------------------------------------------------- kernels
def _logmap0_dense_kernel(z_ref, o_ref, *, inv_sqrt_k, g, d):
    # z_ref: (TR, G, D) block, o_ref: (TR, G*(D-1)) lane-dense block
    tr = z_ref.shape[0]
    z = z_ref[...]                                               # input dtype, no f32 copy
    t = z[:, :, 0:1].astype(jnp.float32).reshape(tr, g)          # dense (G-lane) coef tile
    coef = _coef(t, inv_sqrt_k).reshape(tr, g, 1)                # back to broadcast shape
    y = coef * z[:, :, 1:]                                       # promotes per-vreg to f32
    o_ref[...] = y.reshape(tr, g * (d - 1)).astype(o_ref.dtype)  # lane-dense store


def _logmap0_rows_kernel(z_ref, o_ref, *, inv_sqrt_k):
    # Fallback: z_ref: (TN, D) block, o_ref: (TN, D-1) block.
    # TODO(synk): coef column here is lane-sparse; the dense kernel above is preferred
    #             whenever the shape admits a 128-lane-aligned output packing.
    z = z_ref[...]
    coef = _coef(z[:, 0:1].astype(jnp.float32), inv_sqrt_k)
    o_ref[...] = (coef * z[:, 1:]).astype(o_ref.dtype)


# ----------------------------------------------------------------------------- callers
def _call_dense(z2, g, k):
    n, d = z2.shape
    isz = np.dtype(z2.dtype).itemsize
    out_w = g * (d - 1)
    ng = n // g
    d_pad = -(-d // 128) * 128
    g_pad = -(-g // 8) * 8
    vmem_row = 2 * (g_pad * d_pad + out_w) * isz       # double-buffered in + out (padded)
    hbm_row = (g * d + out_w) * isz
    tr = _pick_tile_rows(ng, hbm_row, vmem_row, isz)
    cost = pl.CostEstimate(flops=n * (d - 1) + 8 * n, transcendentals=2 * n,
                           bytes_accessed=n * d * isz + n * (d - 1) * isz)
    return pl.pallas_call(
        partial(_logmap0_dense_kernel, inv_sqrt_k=float(1.0 / np.sqrt(k)), g=g, d=d),
        out_shape=jax.ShapeDtypeStruct((ng, out_w), z2.dtype),
        grid=(pl.cdiv(ng, tr),),
        in_specs=[pl.BlockSpec((tr, g, d), lambda i: (i, 0, 0))],
        out_specs=pl.BlockSpec((tr, out_w), lambda i: (i, 0)),
        compiler_params=pltpu.CompilerParams(
            dimension_semantics=("parallel",),
            vmem_limit_bytes=int(min(32 << 20, max(16 << 20, tr * vmem_row + (4 << 20))))),
        cost_estimate=cost,
    )(z2.reshape(ng, g, d))                            # free row-major reshape


def _call_rows(z2, k):
    n, d = z2.shape
    isz = np.dtype(z2.dtype).itemsize
    d_pad = -(-d // 128) * 128
    o_pad = -(-(d - 1) // 128) * 128
    vmem_row = 2 * (d_pad + o_pad) * isz
    hbm_row = (2 * d - 1) * isz
    tn = _pick_tile_rows(n, hbm_row, vmem_row, isz)
    cost = pl.CostEstimate(flops=n * (d - 1) + 8 * n, transcendentals=2 * n,
                           bytes_accessed=n * d * isz + n * (d - 1) * isz)
    return pl.pallas_call(
        partial(_logmap0_rows_kernel, inv_sqrt_k=float(1.0 / np.sqrt(k))),
        out_shape=jax.ShapeDtypeStruct((n, d - 1), z2.dtype),
        grid=(pl.cdiv(n, tn),),
        in_specs=[pl.BlockSpec((tn, d), lambda i: (i, 0))],
        out_specs=pl.BlockSpec((tn, d - 1), lambda i: (i, 0)),
        compiler_params=pltpu.CompilerParams(
            dimension_semantics=("parallel",),
            vmem_limit_bytes=int(min(32 << 20, max(16 << 20, tn * vmem_row + (4 << 20))))),
        cost_estimate=cost,
    )(z2)


def vanilla_decoder_layer(z, k=K_CURVATURE):
    """z: (..., A, D) points on the Lorentz hyperboloid -> (..., A*(D-1))."""
    lead = z.shape[:-2]
    A, D = z.shape[-2], z.shape[-1]
    R = int(np.prod(lead, dtype=np.int64)) if lead else 1
    N = R * A
    z2 = z.reshape(N, D)                               # free row-major reshape

    g = _dense_group(N, D - 1)
    if g is not None:
        try:
            # Eager call so any Mosaic relayout-lowering rejection surfaces here.
            out = jax.block_until_ready(_call_dense(z2, g, k))
            return out.reshape(*lead, A * (D - 1))     # free row-major reshape
        except Exception:
            pass                                       # fall back to the row kernel
    out = _call_rows(z2, k)
    return out.reshape(*lead, A * (D - 1))


# ----------------------------------------------------------------------------- test
def _reference(z, k=K_CURVATURE):
    sqrt_k = np.sqrt(k)
    alpha = z[..., 0:1] / sqrt_k
    denom = jnp.sqrt(jnp.maximum(alpha * alpha - 1.0, 1e-15))
    coef = jnp.log(alpha + denom) / denom
    out = coef * z[..., 1:]
    return out.reshape(*z.shape[:-2], -1)


if __name__ == "__main__":
    key = jax.random.PRNGKey(0)
    B, A, Dm1 = 2, 8, 32                               # z: (2, 8, 33) -> out: (2, 256)
    spatial = jax.random.normal(key, (B, A, Dm1), dtype=jnp.float32)
    time = jnp.sqrt(K_CURVATURE + jnp.sum(spatial * spatial, axis=-1, keepdims=True))
    z = jnp.concatenate([time, spatial], axis=-1)      # valid hyperboloid points

    out = vanilla_decoder_layer(z)
    out = jax.block_until_ready(out)

    ref = _reference(z)
    assert out.shape == (B, A * Dm1), out.shape
    np.testing.assert_allclose(np.asarray(out), np.asarray(ref), rtol=1e-5, atol=1e-5)
    print("KERNEL_OK")
</pallas_src>

<mosaic_0001>
module attributes {stable_mosaic.version = 11 : i64} {
  func.func @_logmap0_dense_kernel(%arg0: i32, %arg1: memref<1x16x33xf32, #tpu.memory_space<vmem>>, %arg2: memref<1x512xf32, #tpu.memory_space<vmem>>) attributes {dimension_semantics = [#tpu.dimension_semantics<parallel>], iteration_bounds = array<i64: 1>, scalar_prefetch = 0 : i64, scratch_operands = 0 : i64, tpu.core_type = #tpu.core_type<tc>, window_params = [{transform_indices = @transform_0, window_bounds = array<i64: 1, 16, 33>}, {transform_indices = @transform_1, window_bounds = array<i64: 1, 512>}]} {
    %c0 = arith.constant 0 : index
    %c0_0 = arith.constant 0 : index
    %c0_1 = arith.constant 0 : index
    %0 = vector.load %arg1[%c0, %c0_0, %c0_1] : memref<1x16x33xf32, #tpu.memory_space<vmem>>, vector<1x16x33xf32>
    %1 = vector.extract_strided_slice %0 {offsets = [0, 0, 0], sizes = [1, 16, 1], strides = [1, 1, 1]} : vector<1x16x33xf32> to vector<1x16x1xf32>
    %2 = vector.shape_cast %1 : vector<1x16x1xf32> to vector<1x16xf32>
    %cst = arith.constant 1.000000e+00 : f32
    %3 = vector.broadcast %cst : f32 to vector<1x16xf32>
    %4 = arith.mulf %2, %3 : vector<1x16xf32>
    %5 = arith.mulf %4, %4 : vector<1x16xf32>
    %cst_2 = arith.constant 1.000000e+00 : f32
    %6 = vector.broadcast %cst_2 : f32 to vector<1x16xf32>
    %7 = arith.subf %5, %6 : vector<1x16xf32>
    %cst_3 = arith.constant 1.000000e-15 : f32
    %8 = vector.broadcast %cst_3 : f32 to vector<1x16xf32>
    %9 = arith.maximumf %7, %8 : vector<1x16xf32>
    %10 = math.rsqrt %9 : vector<1x16xf32>
    %11 = arith.mulf %9, %10 : vector<1x16xf32>
    %12 = arith.addf %4, %11 : vector<1x16xf32>
    %13 = math.log %12 : vector<1x16xf32>
    %14 = arith.mulf %13, %10 : vector<1x16xf32>
    %15 = vector.shape_cast %14 : vector<1x16xf32> to vector<1x16x1xf32>
    %16 = vector.extract_strided_slice %0 {offsets = [0, 0, 1], sizes = [1, 16, 32], strides = [1, 1, 1]} : vector<1x16x33xf32> to vector<1x16x32xf32>
    %17 = vector.broadcast %15 : vector<1x16x1xf32> to vector<1x16x32xf32>
    %18 = arith.mulf %17, %16 : vector<1x16x32xf32>
    %19 = vector.shape_cast %18 : vector<1x16x32xf32> to vector<1x512xf32>
    %c0_4 = arith.constant 0 : index
    %c0_5 = arith.constant 0 : index
    %20 = vector.load %arg2[%c0_4, %c0_5] : memref<1x512xf32, #tpu.memory_space<vmem>>, vector<1x512xf32>
    tpu.vector_store %arg2[%c0_4, %c0_5], %19 {strides = array<i32>} : memref<1x512xf32, #tpu.memory_space<vmem>>, vector<1x512xf32>,
    return
  }
  func.func @transform_0(%arg0: i32) -> (i32, i32, i32) {
    %c0_i32 = arith.constant 0 : i32
    %c0_i32_0 = arith.constant 0 : i32
    %c0_i32_1 = arith.constant 0 : i32
    return %arg0, %c0_i32, %c0_i32_0 : i32, i32, i32
  }
  func.func @transform_1(%arg0: i32) -> (i32, i32) {
    %c0_i32 = arith.constant 0 : i32
    %c0_i32_0 = arith.constant 0 : i32
    return %arg0, %c0_i32 : i32, i32
  }
}

module attributes {stable_mosaic.version = 11 : i64} {
  func.func @_logmap0_rows_kernel(%arg0: i32, %arg1: memref<8x33xf32, #tpu.memory_space<vmem>>, %arg2: memref<8x32xf32, #tpu.memory_space<vmem>>) attributes {dimension_semantics = [#tpu.dimension_semantics<parallel>], iteration_bounds = array<i64: 2>, scalar_prefetch = 0 : i64, scratch_operands = 0 : i64, tpu.core_type = #tpu.core_type<tc>, window_params = [{transform_indices = @transform_0, window_bounds = array<i64: 8, 33>}, {transform_indices = @transform_1, window_bounds = array<i64: 8, 32>}]} {
    %c0 = arith.constant 0 : index
    %c0_0 = arith.constant 0 : index
    %0 = vector.load %arg1[%c0, %c0_0] : memref<8x33xf32, #tpu.memory_space<vmem>>, vector<8x33xf32>
    %1 = vector.extract_strided_slice %0 {offsets = [0, 0], sizes = [8, 1], strides = [1, 1]} : vector<8x33xf32> to vector<8x1xf32>
    %cst = arith.constant 1.000000e+00 : f32
    %2 = vector.broadcast %cst : f32 to vector<8x1xf32>
    %3 = arith.mulf %1, %2 : vector<8x1xf32>
    %4 = arith.mulf %3, %3 : vector<8x1xf32>
    %cst_1 = arith.constant 1.000000e+00 : f32
    %5 = vector.broadcast %cst_1 : f32 to vector<8x1xf32>
    %6 = arith.subf %4, %5 : vector<8x1xf32>
    %cst_2 = arith.constant 1.000000e-15 : f32
    %7 = vector.broadcast %cst_2 : f32 to vector<8x1xf32>
    %8 = arith.maximumf %6, %7 : vector<8x1xf32>
    %9 = math.rsqrt %8 : vector<8x1xf32>
    %10 = arith.mulf %8, %9 : vector<8x1xf32>
    %11 = arith.addf %3, %10 : vector<8x1xf32>
    %12 = math.log %11 : vector<8x1xf32>
    %13 = arith.mulf %12, %9 : vector<8x1xf32>
    %14 = vector.extract_strided_slice %0 {offsets = [0, 1], sizes = [8, 32], strides = [1, 1]} : vector<8x33xf32> to vector<8x32xf32>
    %15 = vector.broadcast %13 : vector<8x1xf32> to vector<8x32xf32>
    %16 = arith.mulf %15, %14 : vector<8x32xf32>
    %c0_3 = arith.constant 0 : index
    %c0_4 = arith.constant 0 : index
    %17 = vector.load %arg2[%c0_3, %c0_4] : memref<8x32xf32, #tpu.memory_space<vmem>>, vector<8x32xf32>
    tpu.vector_store %arg2[%c0_3, %c0_4], %16 {strides = array<i32>} : memref<8x32xf32, #tpu.memory_space<vmem>>, vector<8x32xf32>,
    return
  }
  func.func @transform_0(%arg0: i32) -> (i32, i32) {
    %c0_i32 = arith.constant 0 : i32
    %c0_i32_0 = arith.constant 0 : i32
    return %arg0, %c0_i32 : i32, i32
  }
  func.func @transform_1(%arg0: i32) -> (i32, i32) {
    %c0_i32 = arith.constant 0 : i32
    %c0_i32_0 = arith.constant 0 : i32
    return %arg0, %c0_i32 : i32, i32
  }
}

</mosaic_0001>

<bundles_post_ra>
// kernel: tpu_custom_call.1
= control target key start
LH: loop header
LB: loop body
LE: loop exit
PB: predicated region body
PF: predicated region fallthrough
CT: control target
= control target key end

     0   :  { %6 = vsyncpa [#allocation3], 0  ;;  %s381_s0 = inlined_call_operand.hbm [shape: f32[1,16,33], index: 0, kind: input, shape index: {}]   ;;  %s382_s1 = inlined_call_operand.hbm [shape: f32[1,512], index: 1, kind: output, shape index: {}]  }
   0x1   :  { %7 = vsyncpa [#allocation4], 0  ;;  %s341_s6 = smov [#allocation2]  }
   0x2   :  { %s13_s7 = sshll.u32 %s341_s6, 4  ;;  %s14_s7 = int_to_ptr.vmem [resolvable:$true] %s13_s7 }
   0x3   :  { %s305_s8 = scalar_lea.vmem %s14_s7, 256  ;;  %p310_p1 = scmp.lt.s32.totalorder %s14_s7, %s14_s7 }
   0x4   :  { %p306_p0 = scmp.ne.s32.totalorder %s14_s7, %s305_s8  ;;  %p311_p2 = scmp.lt.s32.totalorder %s305_s8, %s305_s8 }
   0x6   :  { %p312_p3 = por %p311_p2, %p310_p1 }
   0x8   :  { %p313_p4 = pnand %p312_p3, %p306_p0 }
   0xa   :  { %316 = shalt.err (!%p313_p4)
}
   0xb   :  { %s342_s9 = smov 128   ;;  %s343_s10 = smov 8  }
   0xc   :  { %19 = dma.hbm_to_vmem [thread:$0]  %s381_s0, 256, %s14_s7, [#allocation3], %s342_s9, %s342_s9, %s343_s10  }
   0xd   :  { %337 = dma.done.wait [#allocation3], 256  }
   0xe   :  { %338 = vsyncadd [#allocation3], 4294967040  ;;  %v344_v0 = vmov 0   ;;  %v23_v1 = vld [vmem:[#allocation2] sm:$0xff]  ;;  %v24_v2 = vld [vmem:[#allocation2 + $0x8] sm:$0xff]  ;;  %s345_s0 = smov 127   ;;  %v67_v27 = vlaneseq }
   0xf   :  { %288 = vset.pattern.permute.xlu0 %v344_v0  ;;  %v25_v3 = vmul.f32 %v23_v1, %v23_v1  ;;  %v26_v4 = vmul.f32 %v24_v2, %v24_v2  ;;  %v346_v25 = vmov 1983009808   ;;  %v347_v28 = vmov 1934713408   ;;  %s349_s13 = smov 32   ;;  %s350_s14 = smov 64  }
  0x10   :  { %v65_v26 = vunpack.c.l.s4 %v346_v25  ;;  %v80_v29 = vunpack.c.l.s4 %v347_v28  ;;  %v368_v31 = vshrl.u32 %v67_v27, 7  ;;  %v348_v36 = vmov 0.0   ;;  %s351_s15 = smov 96   ;;  %s353_s16 = smov [#allocation5]  }
  0x11   :  { %v273_v5 = vadd.f32 -1.0, %v25_v3  ;;  %v274_v6 = vadd.f32 -1.0, %v26_v4  ;;  %vm209_vm0 = vcmask 261120   ;;  %vm211_vm1 = vcmask 523264   ;;  %s264_s17 = sshll.u32 %s353_s16, 4  ;;  %s265_s17 = int_to_ptr.vmem [resolvable:$true] %s264_s17 }
  0x12   :  { %v66_v30 = vunpack.c.0.s8 %v65_v26  ;;  %v81_v32 = vunpack.c.0.s8 %v80_v29  ;;  %vm213_vm2 = vcmask 785408   ;;  %vm255_vm3 = vcmp.lt.s32.totalorder %v67_v27, 512  ;;  %s317_s18 = scalar_lea.vmem %s265_s17, 64  ;;  %p322_p6 = scmp.lt.s32.totalorder %s265_s17, %s265_s17 }
  0x13   :  { %v29_v7 = vmax.f32 %v273_v5, 1e-15  ;;  %v30_v8 = vmax.f32 %v274_v6, 1e-15  ;;  %p318_p5 = scmp.ne.s32.totalorder %s265_s17, %s317_s18  ;;  %p323_p7 = scmp.lt.s32.totalorder %s317_s18, %s317_s18 }
  0x14   :  { %v69_v33 = vsub.s32 %v66_v30, %v368_v31  ;;  %v84_v34 = vsub.s32 %v81_v32, %v368_v31 }
  0x15   :  { %289 = vrsqrt.f32 %v29_v7  ;;  %p324_p8 = por %p323_p7, %p322_p6 }
  0x16   :  { %291 = vrsqrt.f32 %v30_v8 }
  0x17   :  { %p325_p9 = pnand %p324_p8, %p318_p5 }
  0x22   :  { %v290_v9 = vpop.eup %289 }
  0x23   :  { %v292_v10 = vpop.eup %291  ;;  %v33_v11 = vmul.f32 %v290_v9, %v29_v7 }
  0x24   :  { %v34_v12 = vmul.f32 %v292_v10, %v30_v8  ;;  %v352_v8 = vmov 1966171168  }
  0x25   :  { %v35_v13 = vadd.f32 %v33_v11, %v23_v1 }
  0x26   :  { %v36_v14 = vadd.f32 %v34_v12, %v24_v2 }
  0x27   :  { %293 = vlog2.f32 %v35_v13 }
  0x28   :  { %295 = vlog2.f32 %v36_v14 }
  0x34   :  { %v294_v15 = vpop.eup %293 }
  0x35   :  { %v296_v16 = vpop.eup %295  ;;  %v38_v17 = vmul.f32 0.6931472, %v294_v15 }
  0x36   :  { %v40_v18 = vmul.f32 0.6931472, %v296_v16 }
  0x37   :  { %v41_v19 = vmul.f32 %v290_v9, %v38_v17  ;;  %v231_v9 = vunpack.c.l.s4 %v352_v8 }
  0x38   :  { %v42_v20 = vmul.f32 %v292_v10, %v40_v18 }
  0x39   :  { %45 = vperm.xlu0 %288, %v41_v19   ;;  %v232_v13 = vunpack.c.0.s8 %v231_v9 }
  0x3d   :  { %50 = vperm.xlu0 %288, %v42_v20  }
  0xb4   :  { %v46_v21 = vpop.permute.xlu0 %45 }
  0xb5   :  { %v53_v22 = vmul.f32 %v46_v21, %v23_v1 }
  0xb7   :  { %57 = vrot.lane.b32.xlu1 %v53_v22, %s345_s0 }
  0xb8   :  { %v51_v23 = vpop.permute.xlu0 %50 }
  0xb9   :  { %v54_v24 = vmul.f32 %v51_v23, %v24_v2 }
  0xbb   :  { %59 = vrot.lane.b32.xlu1 %v54_v24, %s345_s0  ;;  %v235_v24 = vsub.s32 %v232_v13, %v368_v31 }
 0x129   :  { %v58_v35 = vpop.permute.xlu1 %57 }
 0x12a   :  { %v63_v37 = vcombine.high %v58_v35, %v348_v36  ;;  %v70_v38 = vrot.slane %v58_v35, %v69_v33 }
 0x12c   :  { %v77_v39 = vrot.slane %v63_v37, %v69_v33  ;;  %v85_v40 = vrot.slane %v70_v38, %v84_v34  ;;  %v78_v51 = vcombine.high %v70_v38, %v348_v36 }
 0x12d   :  { %v60_v41 = vpop.permute.xlu1 %59 }
 0x12e   :  { %v100_v42 = vrot.slane %v77_v39, %v84_v34  ;;  %v112_v43 = vcombine.high %v60_v41, %v348_v36  ;;  %v119_v44 = vrot.slane %v60_v41, %v69_v33  ;;  %v108_v45 = vcombine.high %v85_v40, %v348_v36 }
 0x12f   :  { %v93_v52 = vcombine.high %v77_v39, %v348_v36  ;;  %v92_v55 = vrot.slane %v78_v51, %v84_v34 }
 0x130   :  { %v126_v46 = vrot.slane %v112_v43, %v69_v33  ;;  %v134_v47 = vrot.slane %v119_v44, %v84_v34  ;;  %v110_v48 = vcombine.high %v100_v42, %v348_v36  ;;  %162 = vrot.lane.b32.xlu0 %v108_v45, %s349_s13  ;;  %v127_v54 = vcombine.high %v119_v44, %v348_v36 }
 0x131   :  { %v107_v57 = vrot.slane %v93_v52, %v84_v34  ;;  %v109_v60 = vcombine.high %v92_v55, %v348_v36 }
 0x132   :  { %v149_v49 = vrot.slane %v126_v46, %v84_v34  ;;  %174 = vrot.lane.b32.xlu1 %v110_v48, %s349_s13  ;;  %v157_v50 = vcombine.high %v134_v47, %v348_v36  ;;  %v142_v56 = vcombine.high %v126_v46, %v348_v36  ;;  %v141_v58 = vrot.slane %v127_v54, %v84_v34 }
 0x133   :  { %v111_v61 = vcombine.high %v107_v57, %v348_v36 }
 0x134   :  { %v159_v53 = vcombine.high %v149_v49, %v348_v36  ;;  %186 = vrot.lane.b32.xlu0 %v157_v50, %s349_s13  ;;  %v156_v59 = vrot.slane %v142_v56, %v84_v34  ;;  %v158_v62 = vcombine.high %v141_v58, %v348_v36 }
 0x136   :  { %198 = vrot.lane.b32.xlu1 %v159_v53, %s349_s13  ;;  %v160_v63 = vcombine.high %v156_v59, %v348_v36 }
 0x138   :  { %166 = vrot.lane.b32.xlu0 %v92_v55, %s350_s14 }
 0x13a   :  { %178 = vrot.lane.b32.xlu1 %v107_v57, %s350_s14 }
 0x13c   :  { %190 = vrot.lane.b32.xlu0 %v141_v58, %s350_s14 }
 0x13e   :  { %202 = vrot.lane.b32.xlu1 %v156_v59, %s350_s14 }
 0x140   :  { %170 = vrot.lane.b32.xlu0 %v109_v60, %s351_s15 }
 0x142   :  { %182 = vrot.lane.b32.xlu1 %v111_v61, %s351_s15 }
 0x144   :  { %194 = vrot.lane.b32.xlu0 %v158_v62, %s351_s15 }
 0x146   :  { %206 = vrot.lane.b32.xlu1 %v160_v63, %s351_s15 }
 0x1a2   :  { %v163_v0 = vpop.permute.xlu0 %162 }
 0x1a3   :  { %v210_v15 = vsel %vm209_vm0, %v85_v40, %v163_v0 }
 0x1a4   :  { %v175_v1 = vpop.permute.xlu1 %174 }
 0x1a5   :  { %v215_v10 = vsel %vm209_vm0, %v100_v42, %v175_v1 }
 0x1a6   :  { %v187_v2 = vpop.permute.xlu0 %186 }
 0x1a7   :  { %v218_v18 = vsel %vm209_vm0, %v134_v47, %v187_v2 }
 0x1a8   :  { %v199_v3 = vpop.permute.xlu1 %198 }
 0x1a9   :  { %v221_v19 = vsel %vm209_vm0, %v149_v49, %v199_v3 }
 0x1aa   :  { %v167_v4 = vpop.permute.xlu0 %166 }
 0x1ab   :  { %v212_v17 = vsel %vm211_vm1, %v210_v15, %v167_v4 }
 0x1ac   :  { %v179_v5 = vpop.permute.xlu1 %178 }
 0x1ad   :  { %v216_v12 = vsel %vm211_vm1, %v215_v10, %v179_v5 }
 0x1ae   :  { %v191_v6 = vpop.permute.xlu0 %190 }
 0x1af   :  { %v219_v22 = vsel %vm211_vm1, %v218_v18, %v191_v6 }
 0x1b0   :  { %v203_v7 = vpop.permute.xlu1 %202 }
 0x1b1   :  { %v222_v23 = vsel %vm211_vm1, %v221_v19, %v203_v7 }
 0x1b2   :  { %v171_v11 = vpop.permute.xlu0 %170 }
 0x1b3   :  { %v214_v20 = vsel %vm213_vm2, %v212_v17, %v171_v11 }
 0x1b4   :  { %v183_v14 = vpop.permute.xlu1 %182 }
 0x1b5   :  { %v217_v16 = vsel %vm213_vm2, %v216_v12, %v183_v14 }
 0x1b6   :  { %v195_v21 = vpop.permute.xlu0 %194  ;;  %v228_v25 = vcombine.low %v214_v20, %v217_v16 }
 0x1b7   :  { %v220_v28 = vsel %vm213_vm2, %v219_v22, %v195_v21 }
 0x1b8   :  { %v207_v26 = vpop.permute.xlu1 %206  ;;  %v236_v32 = vrot.slane %v228_v25, %v235_v24 }
 0x1b9   :  { %v223_v29 = vsel %vm213_vm2, %v222_v23, %v207_v26 }
 0x1ba   :  { %v229_v30 = vcombine.low %v220_v28, %v223_v29 }
 0x1bc   :  { %v243_v33 = vrot.slane %v229_v30, %v235_v24 }
 0x1be   :  { %v244_v34 = vcombine.low %v236_v32, %v243_v33 }
 0x1c0   :  { %v251_v35 = vrot.slane %v244_v34, %v235_v24 }
 0x1c2   :  { %257 = vst.msk [vmem:[#allocation5] sm:$0xf] %vm255_vm3, %v251_v35 }
 0x1c3   :  { %328 = shalt.err (!%p325_p9)
}
 0x1c4   :  { %267 = dma.vmem_to_hbm [thread:$0]  %s265_s17, 64, %s382_s1, [#allocation4]  }
 0x1c5   :  { %339 = dma.done.wait [#allocation4], 64  }
 0x1c6   :  { %340 = vsyncadd [#allocation4], 4294967232 }
 0x1c7   :  { %271 = vsyncpa [#allocation3], 1 }
 0x1c8   :  { %272 = vsyncpa [#allocation4], 1 }

// kernel: tpu_custom_call.1
= control target key start
LH: loop header
LB: loop body
LE: loop exit
PB: predicated region body
PF: predicated region fallthrough
CT: control target
= control target key end

     0   :  { %6 = vsyncpa [#allocation3], 0  ;;  %s559_s0 = inlined_call_operand.hbm [shape: f32[16,33], index: 0, kind: input, shape index: {}]   ;;  %s560_s1 = inlined_call_operand.hbm [shape: f32[16,32], index: 1, kind: output, shape index: {}]  }
   0x1   :  { %8 = vsyncpa [#allocation3 + $0x1], 0 }
   0x2   :  { %9 = vsyncpa [#allocation4], 0 }
   0x3   :  { %11 = vsyncpa [#allocation4 + $0x1], 0  ;;  %s412_s6 = smov 0   ;;  %s414_s7 = smov 0  }
   0x4   :  { %s416_s8 = smov 0   ;;  %s418_s9 = smov 0  }
   0x5 LB: > { %s433_s10 = sadd.s32 4294967295, %s396_s9   ;;  %s238_s11 = sadd.s32 4294967294, %s396_s9   ;;  %s396_s9 = sphi %s418_s9, %s577_s9   ;;  %s392_s8 = sphi %s416_s8, %s576_s8   ;;  %s388_s7 = sphi %s414_s7, %s575_s7   ;;  %s384_s6 = sphi %s412_s6, %s574_s6  }
   0x6   : > { %s437_s12 = sadd.s32 1, %s396_s9   ;;  %s24_s13 = sadd.s32 1, %s392_s8 }
   0x7   : > { %s21_s14 = ssub.s32 %s396_s9, %s437_s12  ;;  %p31_p0 = scmp.ne.s32.totalorder %s392_s8, %s388_s7 }
   0x8   : > { %p22_p1 = scmp.eq.s32.totalorder %s21_s14, 0  ;;  %p32_p2 = scmp.eq.s32.totalorder %s396_s9, 0 }
   0x9   : > { %p37_p3 = scmp.ne.s32.totalorder %s388_s7, %s384_s6  ;;  %p38_p4 = scmp.eq.s32.totalorder %s433_s10, 0 }
   0xa   : > { %s449_s15 = scalar_select %p22_p1, %s392_s8, %s24_s13  }
   0xb   : > { %p451_p5 = por %p32_p2, %p31_p0  ;;  %p455_p6 = por %p38_p4, %p37_p3 }
   0xc   : > { %p61_p7 = scmp.eq.s32.totalorder %s433_s10, 1  ;;  %p67_p8 = scmp.eq.s32.totalorder %s238_s11, 1 }
   0xd   : > { %s564_s17 = scalar_select %p455_p6, 1, 0 }
   0xe   : > { %p263_p10 = scmp.lt.s32.totalorder %s396_s9, 2  ;;  %p462_p11 = por %p61_p7, %p31_p0 }
   0xf   : > { %p466_p12 = por %p67_p8, %p37_p3  ;;  %s87_s20 = sand.u32 1, %s392_s8  }
  0x10   : > { %s565_s18 = scalar_select %p462_p11, 1, 0 }
  0x11   : > { %s566_s19 = scalar_select %p466_p12, 1, 0 }
  0x12   : > { %s242_s21 = sshll.u32 %s396_s9, 7  ;;  %s241_s22 = sshll.u32 %s87_s20, 3 }
  0x13   : > { %s475_s25 = scalar_lea.hbm %s559_s0, %s242_s21  ;;  %s91_s26 = scalar_lea.vmem [#allocation2], %s241_s22 }
  0x14   : > { %s98_s27 = sshll.u32 %s91_s26, 4  ;;  %p479_p13 = pnand %p263_p10, %p451_p5  ;;  %s483_s27 = int_to_ptr.vmem [resolvable:$true] %s98_s27 }
  0x15   : > { %s88_s29 = scalar_lea.sflag [#allocation3], %s87_s20  ;;  %s304_s30 = scalar_lea.hbm %s475_s25, 128 }
  0x16   : > { %p305_p2 = scmp.ne.s32.totalorder %s475_s25, %s304_s30  ;;  %p306_p3 = pneg %p479_p13 }
  0x17   : > { %s309_s4 = scalar_lea.hbm %s559_s0, 256  ;;  %p310_p5 = scmp.lt.s32.totalorder %s475_s25, %s559_s0 }
  0x18   : > { %p307_p4 = pnand %p306_p3, %p305_p2  ;;  %p311_p8 = scmp.lt.s32.totalorder %s309_s4, %s304_s30 }
  0x1a   : > { %p308_p7 = pneg %p307_p4  ;;  %p312_p10 = por %p311_p8, %p310_p5 }
  0x1c   : > { %p313_p9 = pnand %p312_p10, %p308_p7 }
  0x1e   : > { %316 = shalt.err (!%p313_p9)
}
  0x1f   : > { %s317_s13 = scalar_lea.vmem %s483_s27, 128  ;;  %s398_s14 = smov [#allocation2]  }
  0x20   : > { %p318_p0 = scmp.ne.s32.totalorder %s483_s27, %s317_s13  ;;  %s322_s16 = sshll.u32 %s398_s14, 4  ;;  %s323_s16 = int_to_ptr.vmem [resolvable:$false] %s322_s16 }
  0x21   : > { %s324_s20 = scalar_lea.vmem %s323_s16, 256  ;;  %p325_p4 = scmp.lt.s32.totalorder %s483_s27, %s323_s16 }
  0x22   : > { %p320_p1 = pnand %p318_p0, %p306_p3  ;;  %p326_p12 = scmp.lt.s32.totalorder %s324_s20, %s317_s13 }
  0x24   : > { %p321_p2 = pneg %p320_p1  ;;  %p327_p11 = por %p326_p12, %p325_p4 }
  0x26   : > { %p328_p6 = pnand %p327_p11, %p321_p2 }
  0x28   : > { %331 = shalt.err (!%p328_p6)
}
  0x29   : > { %258 = dma.hbm_to_vmem [thread:$0]  (!%p479_p13), %s475_s25, 128, %s483_s27, %s88_s29  }
  0x2a   : > { %p568_p9 = scmp.lt.s32.totalorder %s396_s9, 3  ;;  %p569_p7 = scmp.ge.s32.totalorder %s396_s9, 1 }
  0x2c   : > { %p104_p0 = pnand %p569_p7, %p568_p9 }
  0x2d   : > { %s510_s21 = sand.u32 (!%p104_p0), 1, %s388_s7   ;;  %p570_p6 = scmp.ne.s32.totalorder (!%p104_p0), %s564_s17, 0 }
  0x2e   : > { %107 = sbr.rel (%p104_p0) target bundleno = 349 (0x15d), region = 24  ;;  %s244_s22 = sshll.u32 (!%p104_p0), %s510_s21, 3 }
  0x2f   : > { %s110_s23 = scalar_lea.sflag (!%p104_p0), [#allocation3], %s510_s21  ;;  %s113_s24 = scalar_lea.vmem (!%p104_p0), [#allocation2], %s244_s22 }
  0x33   : > { %375 = dma.done.wait (%p570_p6), %s110_s23, 128  }
  0x34   : > { %377 = vsyncadd (%p570_p6), %s110_s23, 4294967168  ;;  %v399_v0 = vmov 0   ;;  %v132_v1 = vld [vmem:[%s113_s24] sm:$0xff]  ;;  %s400_s17 = smov 127   ;;  %s248_s25 = sshll.u32 %s433_s10, 7  ;;  %vm152_vm0 = vcmask 261120  }
  0x35   : > { %299 = vset.pattern.permute.xlu0 %v399_v0  ;;  %v133_v2 = vmul.f32 %v132_v1, %v132_v1  ;;  %s131_s26 = scalar_lea.vmem [#allocation5], %s244_s22  ;;  %s522_s30 = scalar_lea.hbm %s560_s1, %s248_s25 }
  0x36   : > { %s168_s27 = sshll.u32 %s131_s26, 4  ;;  %s155_s2 = scalar_lea.sflag [#allocation4], %s510_s21  ;;  %s169_s27 = int_to_ptr.vmem [resolvable:$true] %s168_s27 }
  0x37   : > { %v246_v3 = vadd.f32 -1.0, %v133_v2  ;;  %s332_s3 = scalar_lea.vmem %s169_s27, 128  ;;  %p571_p12 = scmp.ne.s32.totalorder %s565_s18, 0 }
  0x38   : > { %p333_p11 = scmp.ne.s32.totalorder %s169_s27, %s332_s3  ;;  %s401_s4 = smov [#allocation5]  }
  0x39   : > { %v135_v4 = vmax.f32 %v246_v3, 1e-15  ;;  %s336_s5 = sshll.u32 %s401_s4, 4  ;;  %s337_s5 = int_to_ptr.vmem [resolvable:$false] %s336_s5 }
  0x3a   : > { %p334_p13 = pnand %p333_p11, %p571_p12  ;;  %s338_s10 = scalar_lea.vmem %s337_s5, 256 }
  0x3b   : > { %300 = vrsqrt.f32 %v135_v4  ;;  %p339_p3 = scmp.lt.s32.totalorder %s169_s27, %s337_s5  ;;  %p340_p5 = scmp.lt.s32.totalorder %s338_s10, %s332_s3 }
  0x3c   : > { %p335_p1 = pneg %p334_p13 }
  0x3d   : > { %p341_p8 = por %p340_p5, %p339_p3 }
  0x3f   : > { %p342_p10 = pnand %p341_p8, %p335_p1 }
  0x48   : > { %v301_v5 = vpop.eup %300 }
  0x49   : > { %v137_v6 = vmul.f32 %v301_v5, %v135_v4 }
  0x4b   : > { %v138_v7 = vadd.f32 %v137_v6, %v132_v1 }
  0x4d   : > { %302 = vlog2.f32 %v138_v7 }
  0x5a   : > { %v303_v8 = vpop.eup %302 }
  0x5b   : > { %v140_v9 = vmul.f32 0.6931472, %v303_v8 }
  0x5d   : > { %v141_v10 = vmul.f32 %v301_v5, %v140_v9 }
  0x5f   : > { %144 = vperm.xlu0 %299, %v141_v10  }
  0xda   : > { %v145_v11 = vpop.permute.xlu0 %144 }
  0xdb   : > { %v147_v12 = vmul.f32 %v145_v11, %v132_v1 }
  0xdd   : > { %149 = vrot.lane.b32.xlu0 %v147_v12, %s400_s17 }
 0x14f   : > { %v150_v13 = vpop.permute.xlu0 %149 }
 0x150   : > { %153 = vst.msk [vmem:[%s131_s26] sm:$0xff] %vm152_vm0, %v150_v13 }
 0x151   : > { %345 = shalt.err (!%p342_p10)
}
 0x152   : > { %s346_s11 = scalar_lea.hbm %s522_s30, 128  ;;  %s350_s16 = scalar_lea.hbm %s560_s1, 256 }
 0x153   : > { %p347_p2 = scmp.ne.s32.totalorder %s522_s30, %s346_s11  ;;  %p351_p7 = scmp.lt.s32.totalorder %s522_s30, %s560_s1 }
 0x154   : > { %p352_p0 = scmp.lt.s32.totalorder %s350_s16, %s346_s11 }
 0x155   : > { %p348_p4 = pnand %p347_p2, %p571_p12 }
 0x156   : > { %p353_p6 = por %p352_p0, %p351_p7 }
 0x157   : > { %p349_p9 = pneg %p348_p4 }
 0x159   : > { %p354_p11 = pnand %p353_p6, %p349_p9 }
 0x15b   : > { %357 = shalt.err (!%p354_p11)
}
 0x15c   : > { %253 = dma.vmem_to_hbm [thread:$0]  (%p571_p12), %s169_s27, 128, %s522_s30, %s155_s2  }
 0x15d PF: > { %s180_s22 = sand.u32 1, %s384_s6   ;;  %p572_p13 = scmp.ne.s32.totalorder %s566_s19, 0 }
 0x15e   : > { %p573_p1 = scmp.ge.s32.totalorder %s396_s9, 2  ;;  %s181_s23 = scalar_lea.sflag [#allocation4], %s180_s22 }
 0x160   : > { %p260_p3 = pnand %p573_p1, %p572_p13 }
 0x162   : > { %p261_p5 = pneg %p260_p3 }
 0x164   : > { %379 = dma.done.wait (%p261_p5), %s181_s23, 128  }
 0x165   : > { %381 = vsyncadd (%p261_p5), %s181_s23, 4294967168  ;;  %p14_p8 = scmp.ge.s32.totalorder %s437_s12, 4   ;;  %s574_s6 = smov %s388_s7 }
 0x166   : > { %s575_s7 = smov %s392_s8  ;;  %s576_s8 = smov %s449_s15 }
 0x167   : > { %s577_s9 = smov %s437_s12  ;;  %16 = sbr.rel (!%p14_p8) target bundleno = 5 (0x5), region = 69 }
 0x16c   :  { %186 = vsyncpa [#allocation3], 1 }
 0x16d   :  { %188 = vsyncpa [#allocation3 + $0x1], 1 }
 0x16e   :  { %189 = vsyncpa [#allocation4], 1 }
 0x16f   :  { %191 = vsyncpa [#allocation4 + $0x1], 1 }

</bundles_post_ra>
